<compile_context>
chip_gen: v7x
topology: tpu7x:2x2x1
jax: 0.10.0
libtpu: 0.0.40
codegen_flags: <defaults>
</compile_context>

<pallas_src>
import jax
import jax.numpy as jnp
from jax.experimental import pallas as pl
from jax.experimental.pallas import tpu as pltpu


_LANE = 128                       # pad num_classes up to a multiple of this (lane-dense out)
_SMALL_BATCH_MAX = 512            # <= this many rows: grid-less single-residency kernel
_BATCH_TILE = 1024                # target batch tile for the tiled path (multiple of 8)
_VMEM_BUDGET_BYTES = 24 * 1024 * 1024   # guard so the tiled path fits v7x (64 MiB VMEM)


def _round_up(v, m):
    return ((v + m - 1) // m) * m


def _linear_kernel(x_ref, w_ref, b_ref, o_ref):
    # x_ref: [TB, K]; w_ref: [K, C_pad] (pre-transposed once at prep time);
    # b_ref: [1, C_pad]; o_ref: [TB, C_pad] (C_pad multiple of 128 -> unmasked vst).
    x = x_ref[...].astype(jnp.float32)              # == x.float()
    w = w_ref[...]
    acc = jax.lax.dot_general(                      # canonical NN contraction -> no XLU transpose
        x, w,
        dimension_numbers=(((1,), (0,)), ((), ())),
        preferred_element_type=jnp.float32,
        precision=jax.lax.Precision.HIGHEST,        # true-f32 parity with nn.Linear
    )
    o_ref[...] = acc + b_ref[...]                   # VPU bias broadcast-add


def prepare_params(weight, bias):
    """One-time parameter prep: f32 cast + transpose + pad classes to a lane-dense width.

    weight: [num_classes, input_size] (PyTorch layout)  ->  [K, C_pad] f32
    bias:   [num_classes]                               ->  [1, C_pad] f32
    """
    c, k = weight.shape
    c_pad = max(_round_up(c, _LANE), _LANE)
    w_pad = (
        jnp.zeros((k, c_pad), jnp.float32)
        .at[:, :c]
        .set(weight.astype(jnp.float32).T)          # one-time transpose, outside hot path
    )
    b_pad = jnp.zeros((1, c_pad), jnp.float32).at[0, :c].set(bias.astype(jnp.float32))
    return w_pad, b_pad


def _choose_batch_tile(b_rows, k, c_pad):
    """Pick a batch tile: big enough for HBM roofline, >=2 grid steps (v7x megacore),
    and under the VMEM budget (v7x has only 64 MiB VMEM)."""
    # Ensure at least 2 grid steps so dimension_semantics=("parallel",) engages both
    # TensorCores on v7x (no-op on single-TC v5e/v6e).
    tb = min(_BATCH_TILE, max(8, _round_up(pl.cdiv(b_rows, 2), 8)))

    def footprint(t):
        # x double-buffer + out double-buffer + resident weight + bias, all f32.
        return (2 * t * k + 2 * t * c_pad + c_pad * k + c_pad) * 4

    while tb > 8 and footprint(tb) > _VMEM_BUDGET_BYTES:
        tb = max(8, _round_up(tb // 2, 8))
    # TODO(synk): for very large input_size where even tb=8 exceeds budget, add
    # K-tiling with an f32 VMEM accumulator (pl.when init/finalize).
    return tb


def logistic_regression_forward(x, w_pad, b_pad, num_classes):
    """Equivalent of nn.Linear(input_size, num_classes)(x.float()).

    x:      [B, input_size] (any float/int dtype)
    w_pad:  [input_size, C_pad] f32 (from prepare_params; cols >= num_classes are zero)
    b_pad:  [1, C_pad] f32
    returns [B, num_classes] f32
    """
    b_rows, k = x.shape
    c_pad = w_pad.shape[1]

    if b_rows <= _SMALL_BATCH_MAX:
        # Whole problem fits one VMEM residency -> grid-less call, no pipeline overhead.
        out_pad = pl.pallas_call(
            _linear_kernel,
            out_shape=jax.ShapeDtypeStruct((b_rows, c_pad), jnp.float32),
            in_specs=[
                pl.BlockSpec(memory_space=pltpu.MemorySpace.VMEM),
                pl.BlockSpec(memory_space=pltpu.MemorySpace.VMEM),
                pl.BlockSpec(memory_space=pltpu.MemorySpace.VMEM),
            ],
            out_specs=pl.BlockSpec(memory_space=pltpu.MemorySpace.VMEM),
        )(x, w_pad, b_pad)
    else:
        # Stream the batch; keep (small) weight + bias resident across all tiles.
        tb = _choose_batch_tile(b_rows, k, c_pad)
        out_pad = pl.pallas_call(
            _linear_kernel,
            out_shape=jax.ShapeDtypeStruct((b_rows, c_pad), jnp.float32),
            grid=(pl.cdiv(b_rows, tb),),
            in_specs=[
                pl.BlockSpec((tb, k), lambda i: (i, 0)),
                # Constant block index -> fetched once, not re-DMA'd per grid step.
                pl.BlockSpec((k, c_pad), lambda i: (0, 0)),   # weight VMEM-resident
                pl.BlockSpec((1, c_pad), lambda i: (0, 0)),   # bias VMEM-resident
            ],
            out_specs=pl.BlockSpec((tb, c_pad), lambda i: (i, 0)),
            compiler_params=pltpu.CompilerParams(
                dimension_semantics=("parallel",),            # shard tiles across TCs (v7x)
                vmem_limit_bytes=32 * 1024 * 1024,            # safe on v5e/v6e/v7x
            ),
        )(x, w_pad, b_pad)

    return out_pad[:, :num_classes]


if __name__ == "__main__":
    # Small shapes consistent with the module: batch=8, input_size=512, num_classes=10.
    B, INPUT_SIZE, NUM_CLASSES = 8, 512, 10

    key = jax.random.PRNGKey(0)
    kx, kx2, kw, kb = jax.random.split(key, 4)

    # nn.Linear default init: U(-1/sqrt(K), 1/sqrt(K)).
    bound = 1.0 / (INPUT_SIZE ** 0.5)
    weight = jax.random.uniform(
        kw, (NUM_CLASSES, INPUT_SIZE), jnp.float32, minval=-bound, maxval=bound
    )
    bias = jax.random.uniform(
        kb, (NUM_CLASSES,), jnp.float32, minval=-bound, maxval=bound
    )
    x = jax.random.normal(kx, (B, INPUT_SIZE), jnp.float32)

    # One-time parameter prep (outside the hot path).
    w_pad, b_pad = prepare_params(weight, bias)

    fwd = jax.jit(logistic_regression_forward, static_argnums=(3,))

    # Small-batch (grid-less) path.
    out = jax.block_until_ready(fwd(x, w_pad, b_pad, NUM_CLASSES))
    ref = x @ weight.T + bias
    assert out.shape == (B, NUM_CLASSES)
    assert jnp.allclose(out, ref, atol=1e-5, rtol=1e-5)

    # Large-batch (batch-tiled, weight-resident, "parallel", >=2 grid steps) path.
    B_BIG = 1024
    x_big = jax.random.normal(kx2, (B_BIG, INPUT_SIZE), jnp.float32)
    out_big = jax.block_until_ready(fwd(x_big, w_pad, b_pad, NUM_CLASSES))
    ref_big = x_big @ weight.T + bias
    assert out_big.shape == (B_BIG, NUM_CLASSES)
    assert jnp.allclose(out_big, ref_big, atol=1e-4, rtol=1e-4)

    print("KERNEL_OK")
</pallas_src>

<mosaic_0001>
module attributes {stable_mosaic.version = 11 : i64} {
  func.func @_linear_kernel(%arg0: memref<8x512xf32, #tpu.memory_space<vmem>>, %arg1: memref<512x128xf32, #tpu.memory_space<vmem>>, %arg2: memref<1x128xf32, #tpu.memory_space<vmem>>, %arg3: memref<8x128xf32, #tpu.memory_space<vmem>>) attributes {dimension_semantics = [], scalar_prefetch = 0 : i64, scratch_operands = 0 : i64, tpu.core_type = #tpu.core_type<tc>} {
    %c0 = arith.constant 0 : index
    %c0_0 = arith.constant 0 : index
    %0 = vector.load %arg0[%c0, %c0_0] : memref<8x512xf32, #tpu.memory_space<vmem>>, vector<8x512xf32>
    %c0_1 = arith.constant 0 : index
    %c0_2 = arith.constant 0 : index
    %1 = vector.load %arg1[%c0_1, %c0_2] : memref<512x128xf32, #tpu.memory_space<vmem>>, vector<512x128xf32>
    %cst = arith.constant dense<0.000000e+00> : vector<8x128xf32>
    %2 = tpu.matmul %0, %1, %cst {dimension_numbers = #tpu.dot_dimension_numbers<[1], [0], [0], [1], [0, 0, 1, 1], [], []>, precision = #tpu.contract_precision<fp32>} : vector<8x512xf32>, vector<512x128xf32>, vector<8x128xf32> -> vector<8x128xf32>
    %c0_3 = arith.constant 0 : index
    %c0_4 = arith.constant 0 : index
    %3 = vector.load %arg2[%c0_3, %c0_4] : memref<1x128xf32, #tpu.memory_space<vmem>>, vector<1x128xf32>
    %4 = vector.broadcast %3 : vector<1x128xf32> to vector<8x128xf32>
    %5 = arith.addf %2, %4 : vector<8x128xf32>
    %c0_5 = arith.constant 0 : index
    %c0_6 = arith.constant 0 : index
    %6 = vector.load %arg3[%c0_5, %c0_6] : memref<8x128xf32, #tpu.memory_space<vmem>>, vector<8x128xf32>
    tpu.vector_store %arg3[%c0_5, %c0_6], %5 {strides = array<i32>} : memref<8x128xf32, #tpu.memory_space<vmem>>, vector<8x128xf32>,
    return
  }
}

</mosaic_0001>

<bundles_post_ra>
// kernel: logistic_regression_forward.1
= control target key start
LH: loop header
LB: loop body
LE: loop exit
PB: predicated region body
PF: predicated region fallthrough
CT: control target
= control target key end

     0   :  { %8 = vsyncpa [#allocation3], 0  ;;  %s3679_s0 = inlined_call_operand.hbm [shape: f32[8,512], index: 0, kind: input, shape index: {}]   ;;  %s3680_s1 = inlined_call_operand.hbm [shape: f32[512,128], index: 1, kind: input, shape index: {}]   ;;  %s3681_s2 = inlined_call_operand.vmem [shape: f32[1,128], index: 2, kind: input, shape index: {}]   ;;  %s3682_s3 = inlined_call_operand.hbm [shape: f32[8,128], index: 3, kind: output, shape index: {}]  }
   0x1   :  { %9 = vsyncpa [#allocation6], 0 }
   0x2   :  { %10 = vsyncpa [#allocation4], 0  ;;  %s2739_s12 = smov [#allocation2]   ;;  %s2740_s14 = smov [#allocation5]  }
   0x3   :  { %s17_s13 = sshll.u32 %s2739_s12, 4  ;;  %s26_s15 = sshll.u32 %s2740_s14, 4  ;;  %s18_s13 = int_to_ptr.vmem [resolvable:$true] %s17_s13  ;;  %s2764_s15 = int_to_ptr.vmem [resolvable:$true] %s26_s15 }
   0x4   :  { %s2667_s18 = scalar_lea.hbm %s3679_s0, 512 }
   0x5   :  { %p2668_p0 = scmp.ne.s32.totalorder %s3679_s0, %s2667_s18  ;;  %p2671_p1 = scmp.lt.u32.totalorder %s2667_s18, %s3679_s0 }
   0x7   :  { %p2673_p2 = pnand %p2671_p1, %p2668_p0 }
   0x9   :  { %2676 = shalt.err (!%p2673_p2)
}
   0xa   :  { %s2677_s23 = scalar_lea.vmem %s18_s13, 512  ;;  %p2682_p4 = scmp.lt.s32.totalorder %s18_s13, %s18_s13 }
   0xb   :  { %p2678_p3 = scmp.ne.s32.totalorder %s18_s13, %s2677_s23  ;;  %p2683_p5 = scmp.lt.s32.totalorder %s2677_s23, %s2677_s23 }
   0xd   :  { %p2684_p6 = por %p2683_p5, %p2682_p4 }
   0xf   :  { %p2685_p7 = pnand %p2684_p6, %p2678_p3 }
  0x11   :  { %2688 = shalt.err (!%p2685_p7)
}
  0x12   :  { %20 = dma.hbm_to_vmem [thread:$0]  %s3679_s0, 512, %s18_s13, [#allocation3]  }
  0x13   :  { %s2689_s28 = scalar_lea.hbm %s3680_s1, 8192 }
  0x14   :  { %p2690_p8 = scmp.ne.s32.totalorder %s3680_s1, %s2689_s28  ;;  %p2693_p9 = scmp.lt.u32.totalorder %s2689_s28, %s3680_s1 }
  0x16   :  { %p2695_p10 = pnand %p2693_p9, %p2690_p8 }
  0x18   :  { %2698 = shalt.err (!%p2695_p10)
}
  0x19   :  { %s2699_s6 = scalar_lea.vmem %s2764_s15, 8192  ;;  %p2704_p12 = scmp.lt.s32.totalorder %s2764_s15, %s2764_s15 }
  0x1a   :  { %p2700_p11 = scmp.ne.s32.totalorder %s2764_s15, %s2699_s6  ;;  %p2705_p13 = scmp.lt.s32.totalorder %s2699_s6, %s2699_s6 }
  0x1c   :  { %p2706_p0 = por %p2705_p13, %p2704_p12 }
  0x1e   :  { %p2707_p1 = pnand %p2706_p0, %p2700_p11 }
  0x20   :  { %2710 = shalt.err (!%p2707_p1)
}
  0x21   :  { %s2741_s0 = smov 128   ;;  %s2742_s7 = smov 8  }
  0x22   :  { %32 = dma.hbm_to_vmem [thread:$0]  %s3680_s1, 8192, %s2764_s15, [#allocation6], %s2741_s0, %s2741_s0, %s2742_s7  }
  0x23   :  { %2733 = dma.done.wait [#allocation3], 512  }
  0x24   :  { %2734 = vsyncadd [#allocation3], 4294966784 }
  0x25   :  { %2735 = dma.done.wait [#allocation6], 8192  }
  0x26   :  { %2736 = vsyncadd [#allocation6], 4294959104  ;;  %v61_v0 = vld [vmem:[#allocation5 + $0x80] sm:$0xff]  ;;  %v62_v1 = vld [vmem:[#allocation5 + $0x88] sm:$0xff] }
  0x27   :  { %v45_v2 = vld [vmem:[#allocation5] sm:$0xff]  ;;  %v165_v3 = vand.u32 4294901760, %v61_v0  ;;  %v168_v4 = vand.u32 4294901760, %v62_v1  ;;  %v46_v5 = vld [vmem:[#allocation5 + $0x8] sm:$0xff]  ;;  %v63_v7 = vld [vmem:[#allocation5 + $0x90] sm:$0xff] }
  0x28   :  { %v117_v6 = vand.u32 4294901760, %v45_v2  ;;  %v64_v8 = vld [vmem:[#allocation5 + $0x98] sm:$0xff]  ;;  %v120_v9 = vand.u32 4294901760, %v46_v5  ;;  %v171_v10 = vand.u32 4294901760, %v63_v7  ;;  %v47_v12 = vld [vmem:[#allocation5 + $0x10] sm:$0xff]  ;;  %v65_v18 = vld [vmem:[#allocation5 + $0xa0] sm:$0xff] }
  0x29   :  { %v174_v11 = vand.u32 4294901760, %v64_v8  ;;  %v48_v13 = vld [vmem:[#allocation5 + $0x18] sm:$0xff]  ;;  %v2795_v14 = vpack.c.bf16 %v168_v4, %v165_v3  ;;  %v123_v16 = vand.u32 4294901760, %v47_v12  ;;  %v66_v19 = vld [vmem:[#allocation5 + $0xa8] sm:$0xff]  ;;  %v49_v23 = vld [vmem:[#allocation5 + $0x20] sm:$0xff]  ;;  %v177_v29 = vand.u32 4294901760, %v65_v18 }
  0x2a   :  { %v2797_v15 = vsub.f32 %v45_v2, %v117_v6  ;;  %v126_v17 = vand.u32 4294901760, %v48_v13  ;;  %v2799_v20 = vpack.c.bf16 %v120_v9, %v117_v6  ;;  %v2801_v21 = vsub.f32 %v46_v5, %v120_v9  ;;  %v50_v24 = vld [vmem:[#allocation5 + $0x28] sm:$0xff]  ;;  %v67_v37 = vld [vmem:[#allocation5 + $0xb0] sm:$0xff]  ;;  %v68_v42 = vld [vmem:[#allocation5 + $0xb8] sm:$0xff] }
  0x2b   :  { %v2803_v22 = vpack.c.bf16 %v174_v11, %v171_v10  ;;  %2279 = vmatprep.subr.bf16.mxu0 %v2795_v14  ;;  %v2806_v25 = vsub.f32 %v63_v7, %v171_v10  ;;  %v2808_v26 = vsub.f32 %v64_v8, %v174_v11  ;;  %v2812_v28 = vsub.f32 %v47_v12, %v123_v16  ;;  %v51_v55 = vld [vmem:[#allocation5 + $0x30] sm:$0xff]  ;;  %v52_v56 = vld [vmem:[#allocation5 + $0x38] sm:$0xff]  ;;  %v69_v5 = vld [vmem:[#allocation5 + $0xc0] sm:$0xff] }
  0x2c   :  { %v2810_v27 = vpack.c.bf16 %v126_v17, %v123_v16  ;;  %2281 = vmatpush3.bf16.msra.mxu0 %v2799_v20  ;;  %v180_v30 = vand.u32 4294901760, %v66_v19  ;;  %v2815_v31 = vsub.f32 %v61_v0, %v165_v3  ;;  %v2817_v32 = vsub.f32 %v62_v1, %v168_v4  ;;  %v70_v6 = vld [vmem:[#allocation5 + $0xc8] sm:$0xff]  ;;  %v53_v11 = vld [vmem:[#allocation5 + $0x40] sm:$0xff] }
  0x2d   :  { %2283 = vmatprep.subr.bf16.mxu0 %v2803_v22  ;;  %v129_v33 = vand.u32 4294901760, %v49_v23  ;;  %v132_v34 = vand.u32 4294901760, %v50_v24  ;;  %v3698_v35 = vand.u32 4294901760, %v2797_v15  ;;  %v3697_v36 = vand.u32 4294901760, %v2801_v21 }
  0x2e   :  { %v2822_v38 = vsub.f32 %v48_v13, %v126_v17  ;;  %v2824_v39 = vpack.c.bf16 %v180_v30, %v177_v29  ;;  %v2826_v40 = vsub.f32 %v65_v18, %v177_v29  ;;  %v3702_v41 = vand.u32 4294901760, %v2815_v31  ;;  %v54_v29 = vld [vmem:[#allocation5 + $0x48] sm:$0xff] }
  0x2f   :  { %v2829_v43 = vsub.f32 %v66_v19, %v180_v30  ;;  %v3700_v44 = vand.u32 4294901760, %v2817_v32  ;;  %v2832_v45 = vpack.c.bf16 %v132_v34, %v129_v33  ;;  %v2834_v46 = vsub.f32 %v49_v23, %v129_v33 }
  0x30   :  { %2285 = vmatpush3.bf16.msra.mxu0 %v2810_v27  ;;  %v344_v47 = vsub.f32 %v2815_v31, %v3702_v41  ;;  %v232_v48 = vsub.f32 %v2797_v15, %v3698_v35  ;;  %v239_v49 = vsub.f32 %v2801_v21, %v3697_v36  ;;  %v183_v50 = vand.u32 4294901760, %v67_v37  ;;  %v42_v41 = vld [vmem:[#allocation2 + $0x8] sm:$0xff] }
  0x31   :  { %2287 = vmatprep.subr.bf16.mxu0 %v2824_v39  ;;  %v351_v51 = vsub.f32 %v2817_v32, %v3700_v44  ;;  %v186_v52 = vand.u32 4294901760, %v68_v42  ;;  %v3695_v53 = vand.u32 4294901760, %v2806_v25  ;;  %v3693_v54 = vand.u32 4294901760, %v2808_v26 }
  0x32   :  { %v345_v57 = vand.u32 4294901760, %v344_v47  ;;  %v2852_v58 = vsub.f32 %v50_v24, %v132_v34  ;;  %v233_v59 = vand.u32 4294901760, %v232_v48  ;;  %v240_v60 = vand.u32 4294901760, %v239_v49 }
  0x33   :  { %v352_v61 = vand.u32 4294901760, %v351_v51  ;;  %v2854_v62 = vpack.c.bf16 %v186_v52, %v183_v50  ;;  %v2856_v63 = vsub.f32 %v67_v37, %v183_v50  ;;  %v358_v0 = vsub.f32 %v2806_v25, %v3695_v53 }
  0x34   :  { %2289 = vmatpush3.bf16.msra.mxu0 %v2832_v45  ;;  %v2312_v1 = vpack.c.bf16 %v240_v60, %v233_v59  ;;  %v365_v2 = vsub.f32 %v2808_v26, %v3693_v54  ;;  %v135_v3 = vand.u32 4294901760, %v51_v55  ;;  %v138_v4 = vand.u32 4294901760, %v52_v56  ;;  %v72_v59 = vld [vmem:[#allocation5 + $0xd8] sm:$0xff] }
  0x35   :  { %v2310_v7 = vpack.c.bf16 %v352_v61, %v345_v57  ;;  %2291 = vmatprep.subr.bf16.mxu0 %v2854_v62  ;;  %v359_v8 = vand.u32 4294901760, %v358_v0  ;;  %v3692_v9 = vand.u32 4294901760, %v2812_v28  ;;  %v3690_v10 = vand.u32 4294901760, %v2822_v38  ;;  %v71_v57 = vld [vmem:[#allocation5 + $0xd0] sm:$0xff]  ;;  %v76_v54 = vld [vmem:[#allocation5 + $0xf8] sm:$0xff] }
  0x36   :  { %v2868_v12 = vsub.f32 %v68_v42, %v186_v52  ;;  %v366_v13 = vand.u32 4294901760, %v365_v2  ;;  %v2870_v16 = vpack.c.bf16 %v138_v4, %v135_v3  ;;  %v2872_v17 = vsub.f32 %v51_v55, %v135_v3 }
  0x37   :  { %2311 = vmatprep.subr.bf16.mxu1 %v2310_v7  ;;  %v246_v18 = vsub.f32 %v2812_v28, %v3692_v9  ;;  %v253_v19 = vsub.f32 %v2822_v38, %v3690_v10  ;;  %v189_v23 = vand.u32 4294901760, %v69_v5  ;;  %v192_v24 = vand.u32 4294901760, %v70_v6  ;;  %v75_v9 = vld [vmem:[#allocation5 + $0xf0] sm:$0xff] }
  0x38   :  { %2313 = vmatpush3.bf16.msra.mxu1 %v2312_v1  ;;  %v2314_v30 = vpack.c.bf16 %v366_v13, %v359_v8  ;;  %2293 = vmatpush3.bf16.msra.mxu0 %v2870_v16  ;;  %v3688_v33 = vand.u32 4294901760, %v2826_v40  ;;  %v3687_v34 = vand.u32 4294901760, %v2829_v43  ;;  %v141_v37 = vand.u32 4294901760, %v53_v11  ;;  %v55_v1 = vld [vmem:[#allocation5 + $0x50] sm:$0xff] }
  0x39   :  { %v2883_v42 = vsub.f32 %v52_v56, %v138_v4  ;;  %v247_v47 = vand.u32 4294901760, %v246_v18  ;;  %v254_v48 = vand.u32 4294901760, %v253_v19  ;;  %v2885_v49 = vpack.c.bf16 %v192_v24, %v189_v23  ;;  %v56_v18 = vld [vmem:[#allocation5 + $0x58] sm:$0xff] }
  0x3a   :  { %2315 = vmatprep.subr.bf16.mxu1 %v2314_v30  ;;  %v2887_v50 = vsub.f32 %v69_v5, %v189_v23  ;;  %v372_v51 = vsub.f32 %v2826_v40, %v3688_v33  ;;  %v379_v52 = vsub.f32 %v2829_v43, %v3687_v34  ;;  %v144_v55 = vand.u32 4294901760, %v54_v29 }
  0x3b   :  { %v2316_v56 = vpack.c.bf16 %v254_v48, %v247_v47  ;;  %2295 = vmatprep.subr.bf16.mxu0 %v2885_v49  ;;  %v2896_v60 = vsub.f32 %v70_v6, %v192_v24  ;;  %v3685_v61 = vand.u32 4294901760, %v2834_v46  ;;  %v3683_v0 = vand.u32 4294901760, %v2852_v58 }
  0x3c   :  { %v373_v2 = vand.u32 4294901760, %v372_v51  ;;  %v380_v3 = vand.u32 4294901760, %v379_v52  ;;  %v2900_v4 = vpack.c.bf16 %v144_v55, %v141_v37  ;;  %v2902_v5 = vsub.f32 %v53_v11, %v141_v37 }
  0x3d   :  { %2317 = vmatpush3.bf16.msra.mxu1 %v2316_v56  ;;  %v260_v7 = vsub.f32 %v2834_v46, %v3685_v61  ;;  %v267_v6 = vsub.f32 %v2852_v58, %v3683_v0  ;;  %v195_v8 = vand.u32 4294901760, %v71_v57  ;;  %v198_v13 = vand.u32 4294901760, %v72_v59  ;;  %v74_v0 = vld [vmem:[#allocation5 + $0xe8] sm:$0xff] }
  0x3e   :  { %v2318_v19 = vpack.c.bf16 %v380_v3, %v373_v2  ;;  %2297 = vmatpush3.bf16.msra.mxu0 %v2900_v4  ;;  %v3684_v23 = vand.u32 4294901760, %v2856_v63  ;;  %v3686_v11 = vand.u32 4294901760, %v2868_v12  ;;  %v147_v24 = vand.u32 4294901760, %v55_v1  ;;  %v73_v3 = vld [vmem:[#allocation5 + $0xe0] sm:$0xff] }
  0x3f   :  { %v2913_v30 = vsub.f32 %v54_v29, %v144_v55  ;;  %v261_v37 = vand.u32 4294901760, %v260_v7  ;;  %v268_v47 = vand.u32 4294901760, %v267_v6  ;;  %v2915_v48 = vpack.c.bf16 %v198_v13, %v195_v8  ;;  %v57_v6 = vld [vmem:[#allocation5 + $0x60] sm:$0xff] }
  0x40   :  { %2319 = vmatprep.subr.bf16.mxu1 %v2318_v19  ;;  %v2917_v51 = vsub.f32 %v71_v57, %v195_v8  ;;  %v386_v52 = vsub.f32 %v2856_v63, %v3684_v23  ;;  %v393_v56 = vsub.f32 %v2868_v12, %v3686_v11  ;;  %v150_v2 = vand.u32 4294901760, %v56_v18  ;;  %v58_v11 = vld [vmem:[#allocation5 + $0x68] sm:$0xff] }
  0x41   :  { %v2320_v29 = vpack.c.bf16 %v268_v47, %v261_v37  ;;  %2299 = vmatprep.subr.bf16.mxu0 %v2915_v48  ;;  %v2926_v55 = vsub.f32 %v72_v59, %v198_v13  ;;  %v3689_v7 = vand.u32 4294901760, %v2872_v17  ;;  %v3691_v57 = vand.u32 4294901760, %v2883_v42 }
  0x42   :  { %v387_v8 = vand.u32 4294901760, %v386_v52  ;;  %v394_v19 = vand.u32 4294901760, %v393_v56  ;;  %v2930_v23 = vpack.c.bf16 %v150_v2, %v147_v24  ;;  %v2932_v61 = vsub.f32 %v55_v1, %v147_v24 }
  0x43   :  { %2321 = vmatpush3.bf16.msra.mxu1 %v2320_v29  ;;  %v274_v37 = vsub.f32 %v2872_v17, %v3689_v7  ;;  %v281_v59 = vsub.f32 %v2883_v42, %v3691_v57  ;;  %v201_v13 = vand.u32 4294901760, %v73_v3  ;;  %v204_v47 = vand.u32 4294901760, %v74_v0 }
  0x44   :  { %3774 = vst [vmem:[#allocation11_spill] sm:$0xff] %v2930_v23  ;;  %v2322_v34 = vpack.c.bf16 %v394_v19, %v387_v8  ;;  %2301 = vmatpush3.bf16.msra.mxu0 %v2930_v23  ;;  %v3694_v52 = vand.u32 4294901760, %v2887_v50  ;;  %v3696_v1 = vand.u32 4294901760, %v2896_v60  ;;  %v153_v24 = vand.u32 4294901760, %v57_v6 }
  0x45   :  { %v2943_v56 = vsub.f32 %v56_v18, %v150_v2  ;;  %v275_v29 = vand.u32 4294901760, %v274_v37  ;;  %v282_v33 = vand.u32 4294901760, %v281_v59  ;;  %v2945_v7 = vpack.c.bf16 %v204_v47, %v201_v13  ;;  %v59_v37 = vld [vmem:[#allocation5 + $0x70] sm:$0xff] }
  0x46   :  { %2323 = vmatprep.subr.bf16.mxu1 %v2322_v34  ;;  %v2947_v10 = vsub.f32 %v73_v3, %v201_v13  ;;  %v400_v8 = vsub.f32 %v2887_v50, %v3694_v52  ;;  %v407_v19 = vsub.f32 %v2896_v60, %v3696_v1  ;;  %v156_v57 = vand.u32 4294901760, %v58_v11  ;;  %v60_v1 = vld [vmem:[#allocation5 + $0x78] sm:$0xff] }
  0x47   :  { %3775 = vst [vmem:[#allocation12_spill] sm:$0xff] %v2945_v7  ;;  %v2324_v18 = vpack.c.bf16 %v282_v33, %v275_v29  ;;  %2303 = vmatprep.subr.bf16.mxu0 %v2945_v7  ;;  %v2956_v2 = vsub.f32 %v74_v0, %v204_v47  ;;  %v3699_v34 = vand.u32 4294901760, %v2902_v5  ;;  %v3701_v3 = vand.u32 4294901760, %v2913_v30 }
  0x48   :  { %v401_v59 = vand.u32 4294901760, %v400_v8  ;;  %v408_v13 = vand.u32 4294901760, %v407_v19  ;;  %v2960_v52 = vpack.c.bf16 %v156_v57, %v153_v24  ;;  %v2962_v53 = vsub.f32 %v57_v6, %v153_v24 }
  0x49   :  { %2325 = vmatpush3.bf16.msra.mxu1 %v2324_v18  ;;  %v288_v33 = vsub.f32 %v2902_v5, %v3699_v34  ;;  %v295_v0 = vsub.f32 %v2913_v30, %v3701_v3  ;;  %v207_v47 = vand.u32 4294901760, %v75_v9  ;;  %v210_v29 = vand.u32 4294901760, %v76_v54 }
  0x4a   :  { %3776 = vst [vmem:[#allocation13_spill] sm:$0xff] %v2960_v52  ;;  %v2326_v36 = vpack.c.bf16 %v408_v13, %v401_v59  ;;  %2305 = vmatpush3.bf16.msra.mxu0 %v2960_v52  ;;  %v3705_v8 = vand.u32 4294901760, %v2917_v51  ;;  %v3706_v6 = vand.u32 4294901760, %v2926_v55  ;;  %v159_v24 = vand.u32 4294901760, %v59_v37 }
  0x4b   :  { %v2973_v19 = vsub.f32 %v58_v11, %v156_v57  ;;  %v289_v18 = vand.u32 4294901760, %v288_v33  ;;  %v296_v35 = vand.u32 4294901760, %v295_v0  ;;  %v2975_v34 = vpack.c.bf16 %v210_v29, %v207_v47 }
  0x4c   :  { %2327 = vmatprep.subr.bf16.mxu1 %v2326_v36  ;;  %v2977_v44 = vsub.f32 %v75_v9, %v207_v47  ;;  %v414_v59 = vsub.f32 %v2917_v51, %v3705_v8  ;;  %v421_v13 = vsub.f32 %v2926_v55, %v3706_v6  ;;  %v162_v3 = vand.u32 4294901760, %v60_v1  ;;  %v41_v9 = vld [vmem:[#allocation2] sm:$0xff] }
  0x4d   :  { %3777 = vst [vmem:[#allocation14_spill] sm:$0xff] %v2975_v34  ;;  %v2328_v52 = vpack.c.bf16 %v296_v35, %v289_v18  ;;  %2307 = vmatprep.subr.bf16.mxu0 %v2975_v34  ;;  %v2986_v11 = vsub.f32 %v76_v54, %v210_v29  ;;  %v3707_v57 = vand.u32 4294901760, %v2932_v61  ;;  %v3708_v36 = vand.u32 4294901760, %v2943_v56 }
  0x4e   :  { %v415_v33 = vand.u32 4294901760, %v414_v59  ;;  %v422_v0 = vand.u32 4294901760, %v421_v13  ;;  %v2990_v47 = vpack.c.bf16 %v162_v3, %v159_v24  ;;  %v2992_v8 = vsub.f32 %v59_v37, %v159_v24 }
  0x4f   :  { %2329 = vmatpush3.bf16.msra.mxu1 %v2328_v52  ;;  %v302_v35 = vsub.f32 %v2932_v61, %v3707_v57  ;;  %v309_v54 = vsub.f32 %v2943_v56, %v3708_v36  ;;  %v3000_v29 = vand.u32 4294901760, %v42_v41  ;;  %v3711_v18 = vand.u32 4294901760, %v2947_v10 }
  0x50   :  { %3778 = vst [vmem:[#allocation15_spill] sm:$0xff] %v2990_v47  ;;  %v2330_v6 = vpack.c.bf16 %v422_v0, %v415_v33  ;;  %2309 = vmatpush3.bf16.msra.mxu0 %v2990_v47  ;;  %v3717_v59 = vand.u32 4294901760, %v2956_v2  ;;  %v2342_v52 = vpack.c.bf16 %v2817_v32, %v2815_v31  ;;  %v3007_v37 = vand.u32 4294901760, %v41_v9 }
  0x51   :  { %3779 = vst [vmem:[#allocation16_spill] sm:$0xff] %v3000_v29  ;;  %v303_v24 = vand.u32 4294901760, %v302_v35  ;;  %v310_v13 = vand.u32 4294901760, %v309_v54  ;;  %v3010_v57 = vsub.f32 %v42_v41, %v3000_v29  ;;  %v428_v36 = vsub.f32 %v2947_v10, %v3711_v18  ;;  %453 = vmatprep.mubr.f32.mxu1 %v3000_v29 }
  0x52   :  { %2331 = vmatprep.subr.bf16.mxu1 %v2330_v6  ;;  %v435_v33 = vsub.f32 %v2956_v2, %v3717_v59  ;;  %2343 = vmatprep.subr.bf16.mxu0 %v2342_v52  ;;  %v3020_v0 = vsub.f32 %v41_v9, %v3007_v37  ;;  %v3716_v35 = vand.u32 4294901760, %v2962_v53  ;;  %v3718_v41 = vand.u32 4294901760, %v2973_v19 }
  0x53   :  { %v3024_v54 = vsub.f32 %v60_v1, %v162_v3  ;;  %v2332_v47 = vpack.c.bf16 %v310_v13, %v303_v24  ;;  %v3719_v18 = vand.u32 4294901760, %v3010_v57  ;;  %v429_v34 = vand.u32 4294901760, %v428_v36 }
  0x54   :  { %v436_v29 = vand.u32 4294901760, %v435_v33  ;;  %v220_v6 = vand.u32 4294901760, %v3020_v0  ;;  %v316_v52 = vsub.f32 %v2962_v53, %v3716_v35  ;;  %v323_v9 = vsub.f32 %v2973_v19, %v3718_v41 }
  0x55   :  { %2333 = vmatpush3.bf16.msra.mxu1 %v2332_v47  ;;  %v215_v1 = vsub.f32 %v3010_v57, %v3719_v18  ;;  %v2344_v3 = vpack.c.bf16 %v2801_v21, %v2797_v15  ;;  %v3724_v36 = vand.u32 4294901760, %v2977_v44  ;;  %v3727_v24 = vand.u32 4294901760, %v2986_v11 }
  0x56   :  { %v2334_v13 = vpack.c.bf16 %v436_v29, %v429_v34  ;;  %v221_v33 = vsub.f32 %v3020_v0, %v220_v6  ;;  %v317_v35 = vand.u32 4294901760, %v316_v52  ;;  %v324_v59 = vand.u32 4294901760, %v323_v9 }
  0x57   :  { %v216_v41 = vand.u32 4294901760, %v215_v1  ;;  %v442_v47 = vsub.f32 %v2977_v44, %v3724_v36  ;;  %v449_v18 = vsub.f32 %v2986_v11, %v3727_v24  ;;  %v3726_v7 = vand.u32 4294901760, %v2992_v8 }
  0x58   :  { %2335 = vmatprep.subr.bf16.mxu1 %v2334_v13  ;;  %v222_v23 = vand.u32 4294901760, %v221_v33  ;;  %v2336_v34 = vpack.c.bf16 %v324_v59, %v317_v35  ;;  %v2346_v29 = vpack.c.bf16 %v2808_v26, %v2806_v25  ;;  %v3725_v52 = vand.u32 4294901760, %v3024_v54 }
  0x59   :  { %217 = vmatprep.mubr.f32.mxu0 %v216_v41  ;;  %v443_v9 = vand.u32 4294901760, %v442_v47  ;;  %v450_v1 = vand.u32 4294901760, %v449_v18  ;;  %v330_v36 = vsub.f32 %v2992_v8, %v3726_v7  ;;  %v2348_v33 = vpack.c.bf16 %v2822_v38, %v2812_v28 }
  0x5a   :  { %223 = vmatmul.mubr.f32.vlgmr.msra.gmra.mrb[0].mxu0 %v222_v23  ;;  %2337 = vmatpush3.bf16.msra.mxu1 %v2336_v34  ;;  %v337_v13 = vsub.f32 %v3024_v54, %v3725_v52  ;;  %v2350_v41 = vpack.c.bf16 %v2829_v43, %v2826_v40  ;;  %v2352_v23 = vpack.c.bf16 %v2852_v58, %v2834_v46  ;;  %v3781_v34 = vand.u32 4294901760, %v2817_v32 }
  0x5b   :  { %2345 = vmatpush3.bf16.msra.mxu0 %v2344_v3  ;;  %v2338_v59 = vpack.c.bf16 %v450_v1, %v443_v9  ;;  %v331_v35 = vand.u32 4294901760, %v330_v36  ;;  %590 = vmatprep.mubr.f32.mxu0 %v3010_v57  ;;  %v2354_v47 = vpack.c.bf16 %v2868_v12, %v2856_v63  ;;  %v3780_v36 = vand.u32 4294901760, %v2815_v31 }
  0x5c   :  { %2347 = vmatprep.subr.bf16.mxu0 %v2346_v29  ;;  %v338_v18 = vand.u32 4294901760, %v337_v13  ;;  %v3782_v1 = vand.u32 4294901760, %v2797_v15  ;;  %v3783_v29 = vand.u32 4294901760, %v2801_v21  ;;  %v3784_v52 = vand.u32 4294901760, %v2806_v25 }
  0x5d   :  { %2339 = vmatprep.subr.bf16.mxu1 %v2338_v59  ;;  %v2406_v9 = vpack.c.bf16 %v3781_v34, %v3780_v36  ;;  %v3785_v59 = vand.u32 4294901760, %v2808_v26  ;;  %v3786_v24 = vand.u32 4294901760, %v2812_v28  ;;  %v3788_v31 = vand.u32 4294901760, %v2826_v40 }
  0x5e   :  { %v2340_v3 = vpack.c.bf16 %v338_v18, %v331_v35  ;;  %v2408_v13 = vpack.c.bf16 %v3783_v29, %v3782_v1  ;;  %v3787_v35 = vand.u32 4294901760, %v2822_v38  ;;  %v3789_v32 = vand.u32 4294901760, %v2829_v43  ;;  %v3803_v29 = vld [vmem:[#allocation16_spill] sm:$0xff] }
  0x5f   :  { %v2410_v7 = vpack.c.bf16 %v3785_v59, %v3784_v52  ;;  %2349 = vmatpush3.bf16.msra.mxu0 %v2348_v33  ;;  %v3790_v15 = vand.u32 4294901760, %v2834_v46  ;;  %v3791_v21 = vand.u32 4294901760, %v2852_v58  ;;  %v3792_v25 = vand.u32 4294901760, %v2856_v63  ;;  %v94_v59 = vld [vmem:[#allocation5 + $0x188] sm:$0xff] }
  0x60   :  { %v2412_v18 = vpack.c.bf16 %v3787_v35, %v3786_v24  ;;  %v2414_v36 = vpack.c.bf16 %v3789_v32, %v3788_v31  ;;  %v3793_v26 = vand.u32 4294901760, %v2868_v12  ;;  %2341 = vmatpush3.bf16.msra.mxu1 %v2340_v3  ;;  %2351 = vmatprep.subr.bf16.mxu0 %v2350_v41  ;;  %v3794_v28 = vand.u32 4294901760, %v2872_v17  ;;  %v77_v35 = vld [vmem:[#allocation5 + $0x100] sm:$0xff]  ;;  %v78_v31 = vld [vmem:[#allocation5 + $0x108] sm:$0xff]  ;;  %v3804_v32 = vld [vmem:[#allocation13_spill] sm:$0xff] }
  0x61   :  { %v3093_v34 = vpack.c.bf16 %v3791_v21, %v3790_v15  ;;  %v3795_v38 = vand.u32 4294901760, %v2883_v42  ;;  %v3796_v43 = vand.u32 4294901760, %v2887_v50  ;;  %v3797_v46 = vand.u32 4294901760, %v2896_v60  ;;  %2375 = vmatprep.subr.bf16.mxu1 %v2795_v14  ;;  %v3805_v15 = vld [vmem:[#allocation14_spill] sm:$0xff] }
  0x62   :  { %v3099_v52 = vpack.c.bf16 %v3793_v26, %v3792_v25  ;;  %v3798_v63 = vand.u32 4294901760, %v2902_v5  ;;  %v3799_v12 = vand.u32 4294901760, %v2913_v30  ;;  %v2356_v33 = vpack.c.bf16 %v2883_v42, %v2872_v17 }
  0x63   :  { %v3105_v40 = vpack.c.bf16 %v3795_v38, %v3794_v28  ;;  %v3111_v58 = vpack.c.bf16 %v3797_v46, %v3796_v43  ;;  %455 = vmatmul.mubr.f32.vlgmr.msra.gmra.mrb[0].mxu1 %v3007_v37  ;;  %2353 = vmatpush3.bf16.msra.mxu0 %v2352_v23  ;;  %v2358_v41 = vpack.c.bf16 %v2896_v60, %v2887_v50  ;;  %v3800_v3 = vand.u32 4294901760, %v3010_v57  ;;  %v3801_v57 = vld [vmem:[#allocation11_spill] sm:$0xff]  ;;  %v3802_v23 = vld [vmem:[#allocation12_spill] sm:$0xff] }
  0x64   :  { %v3117_v24 = vpack.c.bf16 %v3799_v12, %v3798_v63  ;;  %2377 = vmatpush3.bf16.msra.mxu1 %v2799_v20  ;;  %2355 = vmatprep.subr.bf16.mxu0 %v2354_v47  ;;  %v2360_v1 = vpack.c.bf16 %v2913_v30, %v2902_v5  ;;  %v2362_v17 = vpack.c.bf16 %v2926_v55, %v2917_v51  ;;  %v93_v47 = vld [vmem:[#allocation5 + $0x180] sm:$0xff]  ;;  %v1030_v25 = vand.u32 4294901760, %v94_v59  ;;  %v3806_v28 = vld [vmem:[#allocation15_spill] sm:$0xff]  ;;  %v95_v38 = vld [vmem:[#allocation5 + $0x190] sm:$0xff] }
  0x65   :  { %2379 = vmatprep.subr.bf16.mxu1 %v2803_v22  ;;  %697 = vmatprep.mubr.f32.mxu1 %v3800_v3  ;;  %v2364_v42 = vpack.c.bf16 %v2943_v56, %v2932_v61  ;;  %v2366_v50 = vpack.c.bf16 %v2956_v2, %v2947_v10  ;;  %v2368_v60 = vpack.c.bf16 %v2973_v19, %v2962_v53  ;;  %v1027_v21 = vand.u32 4294901760, %v93_v47  ;;  %v79_v46 = vld [vmem:[#allocation5 + $0x110] sm:$0xff]  ;;  %v80_v63 = vld [vmem:[#allocation5 + $0x118] sm:$0xff] }
  0x66   :  { %v2370_v5 = vpack.c.bf16 %v2986_v11, %v2977_v44  ;;  %v2372_v30 = vpack.c.bf16 %v3024_v54, %v2992_v8  ;;  %v979_v26 = vand.u32 4294901760, %v77_v35  ;;  %v3161_v12 = vsub.f32 %v94_v59, %v1030_v25 }
  0x67   :  { %2357 = vmatpush3.bf16.msra.mxu0 %v2356_v33  ;;  %v3159_v43 = vsub.f32 %v93_v47, %v1027_v21 }
  0x68   :  { %2381 = vmatpush3.bf16.msra.mxu1 %v2810_v27  ;;  %2359 = vmatprep.subr.bf16.mxu0 %v2358_v41  ;;  %v1033_v41 = vand.u32 4294901760, %v95_v38  ;;  %v3737_v59 = vand.u32 4294901760, %v3161_v12 }
  0x69   :  { %2383 = vmatprep.subr.bf16.mxu1 %v2824_v39 }
  0x6b   :  { %2361 = vmatpush3.bf16.msra.mxu0 %v2360_v1  ;;  %v3809_v1 = vand.u32 4294901760, %v2932_v61 }
  0x6c   :  { %2385 = vmatpush3.bf16.msra.mxu1 %v2832_v45  ;;  %2363 = vmatprep.subr.bf16.mxu0 %v2362_v17  ;;  %v3810_v17 = vand.u32 4294901760, %v2943_v56  ;;  %v3815_v56 = vand.u32 4294901760, %v2977_v44  ;;  %v81_v44 = vld [vmem:[#allocation5 + $0x120] sm:$0xff] }
  0x6d   :  { %2387 = vmatprep.subr.bf16.mxu1 %v2854_v62 }
  0x6f   :  { %2365 = vmatpush3.bf16.msra.mxu0 %v2364_v42  ;;  %v2428_v42 = vpack.c.bf16 %v3810_v17, %v3809_v1  ;;  %v99_v17 = vld [vmem:[#allocation5 + $0x1b0] sm:$0xff] }
  0x70   :  { %2389 = vmatpush3.bf16.msra.mxu1 %v2870_v16  ;;  %2367 = vmatprep.subr.bf16.mxu0 %v2366_v50  ;;  %v97_v50 = vld [vmem:[#allocation5 + $0x1a0] sm:$0xff] }
  0x71   :  { %2391 = vmatprep.subr.bf16.mxu1 %v2885_v49 }
  0x73   :  { %2369 = vmatpush3.bf16.msra.mxu0 %v2368_v60  ;;  %v98_v60 = vld [vmem:[#allocation5 + $0x1a8] sm:$0xff] }
  0x74   :  { %2393 = vmatpush3.bf16.msra.mxu1 %v2900_v4  ;;  %2371 = vmatprep.subr.bf16.mxu0 %v2370_v5 }
  0x75   :  { %2395 = vmatprep.subr.bf16.mxu1 %v2915_v48 }
  0x77   :  { %2373 = vmatpush3.bf16.msra.mxu0 %v2372_v30  ;;  %v3818_v30 = vand.u32 4294901760, %v3024_v54 }
  0x78   :  { %2397 = vmatpush3.bf16.msra.mxu1 %v3801_v57  ;;  %2407 = vmatprep.subr.bf16.mxu0 %v2406_v9  ;;  %v982_v9 = vand.u32 4294901760, %v78_v31 }
  0x79   :  { %2399 = vmatprep.subr.bf16.mxu1 %v3802_v23 }
  0x7a   :  { %593 = vmatmul.mubr.f32.vlgmr.msra.gmra.mrb[2].mxu0 %v3020_v0  ;;  %v3165_v33 = vsub.f32 %v78_v31, %v982_v9  ;;  %v3811_v0 = vand.u32 4294901760, %v2947_v10  ;;  %v3816_v10 = vand.u32 4294901760, %v2986_v11 }
  0x7b   :  { %2409 = vmatpush3.bf16.msra.mxu0 %v2408_v13  ;;  %867 = vmatprep.mubr.f32.mxu0 %v3803_v29  ;;  %v96_v13 = vld [vmem:[#allocation5 + $0x198] sm:$0xff] }
  0x7c   :  { %2401 = vmatpush3.bf16.msra.mxu1 %v3804_v32  ;;  %2411 = vmatprep.subr.bf16.mxu0 %v2410_v7  ;;  %v3163_v7 = vsub.f32 %v77_v35, %v979_v26  ;;  %v1036_v3 = vand.u32 4294901760, %v96_v13  ;;  %v3197_v5 = vpack.c.bf16 %v3816_v10, %v3815_v56  ;;  %v82_v35 = vld [vmem:[#allocation5 + $0x128] sm:$0xff]  ;;  %v3728_v31 = vand.u32 4294901760, %v3165_v33 }
  0x7d   :  { %2403 = vmatprep.subr.bf16.mxu1 %v3805_v15 }
  0x7e   :  { %v3734_v11 = vand.u32 4294901760, %v3163_v7  ;;  %v3215_v54 = vpack.c.bf16 %v1036_v3, %v1033_v41 }
  0x7f   :  { %2413 = vmatpush3.bf16.msra.mxu0 %v2412_v18  ;;  %v3807_v18 = vand.u32 4294901760, %v2917_v51  ;;  %v985_v51 = vand.u32 4294901760, %v79_v46 }
  0x80   :  { %2405 = vmatpush3.bf16.msra.mxu1 %v3806_v28  ;;  %2415 = vmatprep.subr.bf16.mxu0 %v2414_v36  ;;  %v3808_v36 = vand.u32 4294901760, %v2926_v55  ;;  %v988_v55 = vand.u32 4294901760, %v80_v63  ;;  %3820 = vst [vmem:[#allocation12_spill] sm:$0xff] %v3215_v54 }
  0x81   :  { %2439 = vmatprep.subr.bf16.mxu1 %v2795_v14 }
  0x82   :  { %v2426_v14 = vpack.c.bf16 %v3808_v36, %v3807_v18  ;;  %v1042_v18 = vand.u32 4294901760, %v98_v60  ;;  %v3223_v36 = vpack.c.bf16 %v988_v55, %v985_v51 }
  0x83   :  { %701 = vmatmul.mubr.f32.vlgmr.msra.gmra.mrb[2].mxu1 %v220_v6  ;;  %2417 = vmatpush3.bf16.msra.mxu0 %v3093_v34  ;;  %v3812_v6 = vand.u32 4294901760, %v2956_v2  ;;  %v3817_v2 = vand.u32 4294901760, %v2992_v8  ;;  %v3213_v8 = vpack.c.bf16 %v982_v9, %v979_v26  ;;  %v991_v9 = vand.u32 4294901760, %v81_v44 }
  0x84   :  { %2441 = vmatpush3.bf16.msra.mxu1 %v2799_v20  ;;  %2419 = vmatprep.subr.bf16.mxu0 %v3099_v52  ;;  %v3813_v20 = vand.u32 4294901760, %v2962_v53  ;;  %v3814_v52 = vand.u32 4294901760, %v2973_v19  ;;  %v44_v53 = vld [vmem:[#allocation2 + $0x18] sm:$0xff]  ;;  %v3207_v19 = vpack.c.bf16 %v1030_v25, %v1027_v21  ;;  %v3219_v21 = vsub.f32 %v95_v38, %v1033_v41  ;;  %3821 = vst [vmem:[#allocation16_spill] sm:$0xff] %v3223_v36 }
  0x85   :  { %v3184_v34 = vpack.c.bf16 %v3812_v6, %v3811_v0  ;;  %2443 = vmatprep.subr.bf16.mxu1 %v2803_v22  ;;  %v3203_v47 = vpack.c.bf16 %v3818_v30, %v3817_v2  ;;  %971 = vmatprep.mubr.f32.mxu1 %v3803_v29  ;;  %v3738_v22 = vand.u32 4294901760, %v3159_v43  ;;  %3819 = vst [vmem:[#allocation11_spill] sm:$0xff] %v3213_v8  ;;  %v1039_v29 = vand.u32 4294901760, %v97_v50 }
  0x86   :  { %v3191_v61 = vpack.c.bf16 %v3814_v52, %v3813_v20  ;;  %v3221_v25 = vsub.f32 %v96_v13, %v1036_v3  ;;  %v3225_v1 = vand.u32 4294901760, %v44_v53  ;;  %v3233_v38 = vsub.f32 %v80_v63, %v988_v55  ;;  %v83_v52 = vld [vmem:[#allocation5 + $0x130] sm:$0xff] }
  0x87   :  { %2421 = vmatpush3.bf16.msra.mxu0 %v3105_v40  ;;  %v3228_v40 = vsub.f32 %v79_v46, %v985_v51  ;;  %v1206_v26 = vsub.f32 %v3159_v43, %v3738_v22  ;;  %v1213_v13 = vsub.f32 %v3161_v12, %v3737_v59  ;;  %v1101_v46 = vsub.f32 %v3165_v33, %v3728_v31  ;;  %v101_v31 = vld [vmem:[#allocation5 + $0x1c0] sm:$0xff]  ;;  %v88_v22 = vld [vmem:[#allocation5 + $0x158] sm:$0xff] }
  0x88   :  { %2445 = vmatpush3.bf16.msra.mxu1 %v2810_v27  ;;  %2423 = vmatprep.subr.bf16.mxu0 %v3111_v58  ;;  %3822 = vst [vmem:[#allocation13_spill] sm:$0xff] %v3225_v1  ;;  %v994_v27 = vand.u32 4294901760, %v82_v35  ;;  %v100_v58 = vld [vmem:[#allocation5 + $0x1b8] sm:$0xff]  ;;  %v3245_v41 = vpack.c.bf16 %v1042_v18, %v1039_v29  ;;  %v3247_v3 = vsub.f32 %v97_v50, %v1039_v29  ;;  %v1045_v6 = vand.u32 4294901760, %v99_v17 }
  0x89   :  { %2447 = vmatprep.subr.bf16.mxu1 %v2824_v39  ;;  %v1094_v39 = vsub.f32 %v3163_v7, %v3734_v11  ;;  %v3249_v63 = vsub.f32 %v98_v60, %v1042_v18  ;;  %v3252_v0 = vsub.f32 %v44_v53, %v3225_v1  ;;  %v1048_v51 = vand.u32 4294901760, %v100_v58 }
  0x8a   :  { %3823 = vst [vmem:[#allocation14_spill] sm:$0xff] %v3245_v41  ;;  %v3732_v55 = vand.u32 4294901760, %v3219_v21  ;;  %v3729_v20 = vand.u32 4294901760, %v3221_v25  ;;  %v1207_v50 = vand.u32 4294901760, %v1206_v26  ;;  %v3258_v56 = vpack.c.bf16 %v994_v27, %v991_v9 }
  0x8b   :  { %2425 = vmatpush3.bf16.msra.mxu0 %v3117_v24  ;;  %v84_v24 = vld [vmem:[#allocation5 + $0x138] sm:$0xff]  ;;  %v3260_v60 = vsub.f32 %v81_v44, %v991_v9  ;;  %v3262_v10 = vsub.f32 %v82_v35, %v994_v27  ;;  %v1214_v2 = vand.u32 4294901760, %v1213_v13  ;;  %v3731_v30 = vand.u32 4294901760, %v3228_v40  ;;  %v102_v27 = vld [vmem:[#allocation5 + $0x1c8] sm:$0xff] }
  0x8c   :  { %2449 = vmatpush3.bf16.msra.mxu1 %v2832_v45  ;;  %2427 = vmatprep.subr.bf16.mxu0 %v2426_v14  ;;  %3824 = vst [vmem:[#allocation15_spill] sm:$0xff] %v3258_v56  ;;  %v1095_v45 = vand.u32 4294901760, %v1094_v39  ;;  %v1102_v14 = vand.u32 4294901760, %v1101_v46  ;;  %v997_v53 = vand.u32 4294901760, %v83_v52  ;;  %v1000_v29 = vand.u32 4294901760, %v84_v24 }
  0x8d   :  { %2451 = vmatprep.subr.bf16.mxu1 %v2854_v62  ;;  %v3730_v18 = vand.u32 4294901760, %v3233_v38  ;;  %v3741_v62 = vand.u32 4294901760, %v3252_v0  ;;  %v3269_v44 = vpack.c.bf16 %v1048_v51, %v1045_v6  ;;  %v1220_v35 = vsub.f32 %v3219_v21, %v3732_v55 }
  0x8e   :  { %v3278_v26 = vsub.f32 %v99_v17, %v1045_v6  ;;  %v3280_v9 = vsub.f32 %v100_v58, %v1048_v51  ;;  %v3284_v13 = vpack.c.bf16 %v1214_v2, %v1207_v50  ;;  %v3286_v39 = vpack.c.bf16 %v1102_v14, %v1095_v45 }
  0x8f   :  { %2429 = vmatpush3.bf16.msra.mxu0 %v2428_v42  ;;  %3825 = vst [vmem:[#allocation17_spill] sm:$0xff] %v3269_v44  ;;  %v1227_v42 = vsub.f32 %v3221_v25, %v3729_v20  ;;  %v1108_v46 = vsub.f32 %v3228_v40, %v3731_v30  ;;  %v1051_v20 = vand.u32 4294901760, %v101_v31  ;;  %v1115_v17 = vsub.f32 %v3233_v38, %v3730_v18 }
  0x90   :  { %2453 = vmatpush3.bf16.msra.mxu1 %v2870_v16  ;;  %2431 = vmatprep.subr.bf16.mxu0 %v3184_v34  ;;  %v3733_v16 = vand.u32 4294901760, %v3247_v3  ;;  %v3736_v34 = vand.u32 4294901760, %v3249_v63  ;;  %v3735_v58 = vand.u32 4294901760, %v3260_v60  ;;  %v1077_v6 = vsub.f32 %v3252_v0, %v3741_v62 }
  0x91   :  { %2455 = vmatprep.subr.bf16.mxu1 %v2885_v49  ;;  %v3292_v49 = vpack.c.bf16 %v1000_v29, %v997_v53  ;;  %v1221_v51 = vand.u32 4294901760, %v1220_v35  ;;  %v1228_v50 = vand.u32 4294901760, %v1227_v42  ;;  %v1054_v2 = vand.u32 4294901760, %v102_v27  ;;  %v86_v42 = vld [vmem:[#allocation5 + $0x148] sm:$0xff] }
  0x92   :  { %v3740_v45 = vand.u32 4294901760, %v3262_v10  ;;  %v3305_v14 = vsub.f32 %v83_v52, %v997_v53  ;;  %v3307_v18 = vsub.f32 %v84_v24, %v1000_v29  ;;  %v1234_v30 = vsub.f32 %v3247_v3, %v3733_v16  ;;  %v103_v29 = vld [vmem:[#allocation5 + $0x1d0] sm:$0xff]  ;;  %v104_v16 = vld [vmem:[#allocation5 + $0x1d8] sm:$0xff] }
  0x93   :  { %2433 = vmatpush3.bf16.msra.mxu0 %v3191_v61  ;;  %3826 = vst [vmem:[#allocation18_spill] sm:$0xff] %v3292_v49  ;;  %v85_v61 = vld [vmem:[#allocation5 + $0x140] sm:$0xff]  ;;  %v3315_v35 = vsub.f32 %v101_v31, %v1051_v20  ;;  %v3739_v55 = vand.u32 4294901760, %v3278_v26  ;;  %v1116_v52 = vand.u32 4294901760, %v1115_v17  ;;  %v1122_v53 = vsub.f32 %v3260_v60, %v3735_v58 }
  0x94   :  { %2457 = vmatpush3.bf16.msra.mxu1 %v2900_v4  ;;  %2435 = vmatprep.subr.bf16.mxu0 %v3197_v5  ;;  %v1241_v4 = vsub.f32 %v3249_v63, %v3736_v34  ;;  %v1109_v5 = vand.u32 4294901760, %v1108_v46  ;;  %v1003_v24 = vand.u32 4294901760, %v85_v61  ;;  %v1078_v11 = vand.u32 4294901760, %v1077_v6  ;;  %v87_v6 = vld [vmem:[#allocation5 + $0x150] sm:$0xff] }
  0x95   :  { %2459 = vmatprep.subr.bf16.mxu1 %v2915_v48  ;;  %v3742_v48 = vand.u32 4294901760, %v3280_v9  ;;  %v3325_v31 = vpack.c.bf16 %v1228_v50, %v1221_v51  ;;  %v3327_v46 = vpack.c.bf16 %v1054_v2, %v1051_v20  ;;  %v3333_v17 = vsub.f32 %v102_v27, %v1054_v2 }
  0x96   :  { %v1235_v58 = vand.u32 4294901760, %v1234_v30  ;;  %v1242_v34 = vand.u32 4294901760, %v1241_v4  ;;  %v1006_v59 = vand.u32 4294901760, %v86_v42  ;;  %v1060_v51 = vand.u32 4294901760, %v104_v16 }
  0x97   :  { %2437 = vmatpush3.bf16.msra.mxu0 %v3203_v47  ;;  %3827 = vst [vmem:[#allocation19_spill] sm:$0xff] %v3327_v46  ;;  %v1129_v47 = vsub.f32 %v3262_v10, %v3740_v45  ;;  %v1248_v20 = vsub.f32 %v3278_v26, %v3739_v55  ;;  %v1255_v50 = vsub.f32 %v3280_v9, %v3742_v48  ;;  %v1123_v27 = vand.u32 4294901760, %v1122_v53  ;;  %v105_v48 = vld [vmem:[#allocation5 + $0x1e0] sm:$0xff]  ;;  %v106_v53 = vld [vmem:[#allocation5 + $0x1e8] sm:$0xff] }
  0x98   :  { %2461 = vmatpush3.bf16.msra.mxu1 %v3801_v57  ;;  %2471 = vmatprep.subr.bf16.mxu0 %v3207_v19  ;;  %v1057_v57 = vand.u32 4294901760, %v103_v29  ;;  %v3345_v30 = vsub.f32 %v85_v61, %v1003_v24  ;;  %v1009_v55 = vand.u32 4294901760, %v87_v6  ;;  %v1012_v45 = vand.u32 4294901760, %v88_v22 }
  0x99   :  { %2463 = vmatprep.subr.bf16.mxu1 %v3802_v23  ;;  %v3343_v23 = vpack.c.bf16 %v1116_v52, %v1109_v5  ;;  %v1130_v4 = vand.u32 4294901760, %v1129_v47  ;;  %v3747_v62 = vand.u32 4294901760, %v3307_v18  ;;  %v3352_v5 = vpack.c.bf16 %v1242_v34, %v1235_v58 }
  0x9a   :  { %869 = vmatmul.mubr.f32.vlgmr.msra.gmra.mrb[4].mxu0 %v3007_v37  ;;  %v3354_v61 = vpack.c.bf16 %v1006_v59, %v1003_v24  ;;  %v3356_v52 = vsub.f32 %v86_v42, %v1006_v59  ;;  %v1249_v2 = vand.u32 4294901760, %v1248_v20  ;;  %v1256_v47 = vand.u32 4294901760, %v1255_v50  ;;  %v3389_v50 = vld [vmem:[#allocation5 + $0x168] sm:$0xff] }
  0x9b   :  { %2473 = vmatpush3.bf16.msra.mxu0 %v3213_v8  ;;  %1079 = vmatprep.mubr.f32.mxu0 %v1078_v11  ;;  %v3749_v11 = vand.u32 4294901760, %v3315_v35  ;;  %v3362_v8 = vld [vmem:[#allocation5 + $0x160] sm:$0xff]  ;;  %v3367_v34 = vsub.f32 %v104_v16, %v1060_v51  ;;  %v3831_v59 = vand.u32 4294901760, %v3305_v14  ;;  %v1063_v42 = vand.u32 4294901760, %v105_v48 }
  0x9c   :  { %2465 = vmatpush3.bf16.msra.mxu1 %v3804_v32  ;;  %2475 = vmatprep.subr.bf16.mxu0 %v3215_v54  ;;  %v3359_v32 = vpack.c.bf16 %v1060_v51, %v1057_v57  ;;  %v3748_v54 = vand.u32 4294901760, %v3333_v17  ;;  %v3374_v24 = vpack.c.bf16 %v1130_v4, %v1123_v27  ;;  %v3376_v20 = vpack.c.bf16 %v1012_v45, %v1009_v55 }
  0x9d   :  { %2467 = vmatprep.subr.bf16.mxu1 %v3805_v15  ;;  %v3365_v15 = vsub.f32 %v103_v29, %v1057_v57  ;;  %3830 = vst [vmem:[#allocation22_spill] sm:$0xff] %v3367_v34  ;;  %v1136_v58 = vsub.f32 %v3305_v14, %v3831_v59  ;;  %v1143_v29 = vsub.f32 %v3307_v18, %v3747_v62  ;;  %v1066_v57 = vand.u32 4294901760, %v106_v53 }
  0x9e   :  { %3828 = vst [vmem:[#allocation20_spill] sm:$0xff] %v3359_v32  ;;  %v3382_v16 = vsub.f32 %v87_v6, %v1009_v55  ;;  %v3384_v51 = vsub.f32 %v88_v22, %v1012_v45  ;;  %v3750_v27 = vand.u32 4294901760, %v3362_v8  ;;  %v2514_v4 = vpack.c.bf16 %v1256_v47, %v1249_v2  ;;  %v3399_v22 = vld [vmem:[#allocation5 + $0x1f8] sm:$0xff]  ;;  %v3422_v2 = vld [vmem:[#allocation5 + $0x170] sm:$0xff] }
  0x9f   :  { %2477 = vmatpush3.bf16.msra.mxu0 %v3223_v36  ;;  %3829 = vst [vmem:[#allocation21_spill] sm:$0xff] %v3365_v15  ;;  %v1269_v59 = vsub.f32 %v3333_v17, %v3748_v54  ;;  %v1137_v45 = vand.u32 4294901760, %v1136_v58  ;;  %v3403_v6 = vsub.f32 %v105_v48, %v1063_v42  ;;  %v43_v54 = vld [vmem:[#allocation2 + $0x10] sm:$0xff]  ;;  %v3409_v55 = vpack.c.bf16 %v1066_v57, %v1063_v42  ;;  %v3424_v42 = vld [vmem:[#allocation5 + $0x178] sm:$0xff] }
  0xa0   :  { %2469 = vmatpush3.bf16.msra.mxu1 %v3806_v28  ;;  %2479 = vmatprep.subr.bf16.mxu0 %v3245_v41  ;;  %v1262_v28 = vsub.f32 %v3315_v35, %v3749_v11  ;;  %v1144_v11 = vand.u32 4294901760, %v1143_v29  ;;  %v3411_v62 = vsub.f32 %v106_v53, %v1066_v57  ;;  %v3418_v58 = vsub.f32 %v3362_v8, %v3750_v27 }
  0xa1   :  { %2503 = vmatprep.subr.bf16.mxu1 %v3284_v13  ;;  %v3397_v13 = vld [vmem:[#allocation5 + $0x1f0] sm:$0xff]  ;;  %v1270_v53 = vand.u32 4294901760, %v1269_v59  ;;  %v3832_v29 = vand.u32 4294901760, %v3345_v30  ;;  %v3833_v57 = vand.u32 4294901760, %v3356_v52  ;;  %v3433_v27 = vand.u32 4294901760, %v43_v54 }
  0xa2   :  { %v1263_v48 = vand.u32 4294901760, %v1262_v28  ;;  %v1069_v47 = vand.u32 4294901760, %v3397_v13  ;;  %v3835_v41 = vand.u32 4294901760, %v3367_v34 }
  0xa3   :  { %973 = vmatmul.mubr.f32.vlgmr.msra.gmra.mrb[4].mxu1 %v3007_v37  ;;  %2481 = vmatpush3.bf16.msra.mxu0 %v3258_v56  ;;  %v1018_v37 = vand.u32 4294901760, %v3389_v50  ;;  %v1157_v28 = vsub.f32 %v3356_v52, %v3833_v57  ;;  %v2516_v57 = vpack.c.bf16 %v1144_v11, %v1137_v45 }
  0xa4   :  { %2505 = vmatpush3.bf16.msra.mxu1 %v3286_v39  ;;  %2483 = vmatprep.subr.bf16.mxu0 %v3269_v44  ;;  %v1072_v39 = vand.u32 4294901760, %v3399_v22  ;;  %v3834_v44 = vand.u32 4294901760, %v3365_v15  ;;  %v1283_v59 = vsub.f32 %v3367_v34, %v3835_v41  ;;  %v3453_v41 = vsub.f32 %v3397_v13, %v1069_v47 }
  0xa5   :  { %2507 = vmatprep.subr.bf16.mxu1 %v3325_v31  ;;  %1315 = vmatprep.mubr.f32.mxu1 %v3225_v1  ;;  %v1150_v31 = vsub.f32 %v3345_v30, %v3832_v29  ;;  %v3447_v36 = vsub.f32 %v3389_v50, %v1018_v37  ;;  %v3771_v29 = vand.u32 4294901760, %v3411_v62  ;;  %v2518_v11 = vpack.c.bf16 %v1270_v53, %v1263_v48 }
  0xa6   :  { %v1276_v56 = vsub.f32 %v3365_v15, %v3834_v44  ;;  %v1024_v44 = vand.u32 4294901760, %v3424_v42  ;;  %v3456_v1 = vsub.f32 %v3399_v22, %v1072_v39  ;;  %v1158_v50 = vand.u32 4294901760, %v1157_v28 }
  0xa7   :  { %2485 = vmatpush3.bf16.msra.mxu0 %v3292_v49  ;;  %v1021_v49 = vand.u32 4294901760, %v3422_v2  ;;  %v1151_v45 = vand.u32 4294901760, %v1150_v31  ;;  %v3836_v13 = vand.u32 4294901760, %v3382_v16  ;;  %v3837_v22 = vand.u32 4294901760, %v3384_v51 }
  0xa8   :  { %2509 = vmatpush3.bf16.msra.mxu1 %v3343_v23  ;;  %2487 = vmatprep.subr.bf16.mxu0 %v3327_v46  ;;  %v3461_v46 = vsub.f32 %v43_v54, %v3433_v27  ;;  %v1277_v34 = vand.u32 4294901760, %v1276_v56  ;;  %v3476_v54 = vsub.f32 %v3424_v42, %v1024_v44  ;;  %v3838_v31 = vand.u32 4294901760, %v3403_v6 }
  0xa9   :  { %2511 = vmatprep.subr.bf16.mxu1 %v3352_v5  ;;  %v1284_v5 = vand.u32 4294901760, %v1283_v59  ;;  %v1164_v15 = vsub.f32 %v3382_v16, %v3836_v13  ;;  %v1171_v23 = vsub.f32 %v3384_v51, %v3837_v22  ;;  %v3473_v48 = vsub.f32 %v3422_v2, %v1021_v49 }
  0xaa   :  { %v1290_v28 = vsub.f32 %v3403_v6, %v3838_v31  ;;  %v1303_v59 = vand.u32 4294901760, %v3453_v41  ;;  %v3839_v42 = vand.u32 4294901760, %v3362_v8  ;;  %v3492_v22 = vpack.c.bf16 %v1072_v39, %v1069_v47 }
  0xab   :  { %2489 = vmatpush3.bf16.msra.mxu0 %v3354_v61  ;;  %v2520_v53 = vpack.c.bf16 %v1158_v50, %v1151_v45  ;;  %v2522_v31 = vpack.c.bf16 %v1284_v5, %v1277_v34  ;;  %v1165_v56 = vand.u32 4294901760, %v1164_v15  ;;  %v3841_v8 = vand.u32 4294901760, %v3447_v36 }
  0xac   :  { %2513 = vmatpush3.bf16.msra.mxu1 %v3374_v24  ;;  %2491 = vmatprep.subr.bf16.mxu0 %v3359_v32  ;;  %v1297_v24 = vsub.f32 %v3411_v62, %v3771_v29  ;;  %v3490_v13 = vpack.c.bf16 %v1018_v37, %v3839_v42  ;;  %v1172_v32 = vand.u32 4294901760, %v1171_v23  ;;  %v3840_v29 = vand.u32 4294901760, %v3418_v58 }
  0xad   :  { %2515 = vmatprep.subr.bf16.mxu1 %v2514_v4  ;;  %v1082_v4 = vand.u32 4294901760, %v3461_v46  ;;  %v1185_v47 = vsub.f32 %v3447_v36, %v3841_v8  ;;  %v3772_v37 = vand.u32 4294901760, %v3473_v48  ;;  %v3773_v39 = vand.u32 4294901760, %v3476_v54 }
  0xae   :  { %v1178_v2 = vsub.f32 %v3418_v58, %v3840_v29  ;;  %v1291_v45 = vand.u32 4294901760, %v1290_v28  ;;  %v1298_v34 = vand.u32 4294901760, %v1297_v24  ;;  %v1304_v15 = vsub.f32 %v3453_v41, %v1303_v59 }
  0xaf   :  { %2493 = vmatpush3.bf16.msra.mxu0 %v3376_v20  ;;  %v1083_v29 = vsub.f32 %v3461_v46, %v1082_v4  ;;  %v3515_v50 = vpack.c.bf16 %v1024_v44, %v1021_v49  ;;  %v2524_v5 = vpack.c.bf16 %v1172_v32, %v1165_v56  ;;  %v1186_v24 = vand.u32 4294901760, %v1185_v47 }
  0xb0   :  { %2517 = vmatpush3.bf16.msra.mxu1 %v2516_v57  ;;  %2495 = vmatprep.subr.bf16.mxu0 %v3409_v55  ;;  %v3842_v57 = vand.u32 4294901760, %v3456_v1  ;;  %v1179_v28 = vand.u32 4294901760, %v1178_v2  ;;  %v1192_v42 = vsub.f32 %v3473_v48, %v3772_v37  ;;  %v1199_v8 = vsub.f32 %v3476_v54, %v3773_v39 }
  0xb1   :  { %2519 = vmatprep.subr.bf16.mxu1 %v2518_v11  ;;  %v2534_v11 = vpack.c.bf16 %v3161_v12, %v3159_v43  ;;  %v2526_v49 = vpack.c.bf16 %v1298_v34, %v1291_v45  ;;  %v1305_v44 = vand.u32 4294901760, %v1304_v15  ;;  %v1084_v56 = vand.u32 4294901760, %v1083_v29  ;;  %v3843_v29 = vld [vmem:[#allocation11_spill] sm:$0xff] }
  0xb2   :  { %v1311_v23 = vsub.f32 %v3456_v1, %v3842_v57  ;;  %v2528_v2 = vpack.c.bf16 %v1186_v24, %v1179_v28  ;;  %v2538_v47 = vpack.c.bf16 %v3221_v25, %v3219_v21  ;;  %v1193_v57 = vand.u32 4294901760, %v1192_v42  ;;  %v3846_v24 = vld [vmem:[#allocation16_spill] sm:$0xff]  ;;  %v3847_v42 = vld [vmem:[#allocation21_spill] sm:$0xff] }
  0xb3   :  { %2497 = vmatpush3.bf16.msra.mxu0 %v3490_v13  ;;  %v1200_v37 = vand.u32 4294901760, %v1199_v8  ;;  %v2542_v34 = vpack.c.bf16 %v3249_v63, %v3247_v3  ;;  %v2544_v15 = vpack.c.bf16 %v3262_v10, %v3260_v60  ;;  %v2552_v28 = vpack.c.bf16 %v3356_v52, %v3345_v30  ;;  %v3848_v8 = vld [vmem:[#allocation22_spill] sm:$0xff] }
  0xb4   :  { %2521 = vmatpush3.bf16.msra.mxu1 %v2520_v53  ;;  %2499 = vmatprep.subr.bf16.mxu0 %v3492_v22  ;;  %v1312_v32 = vand.u32 4294901760, %v1311_v23  ;;  %v2536_v53 = vpack.c.bf16 %v3165_v33, %v3163_v7  ;;  %v2546_v23 = vpack.c.bf16 %v3280_v9, %v3278_v26 }
  0xb5   :  { %2523 = vmatprep.subr.bf16.mxu1 %v2522_v31  ;;  %v2540_v31 = vpack.c.bf16 %v3233_v38, %v3228_v40  ;;  %v2532_v45 = vpack.c.bf16 %v1200_v37, %v1193_v57  ;;  %v2548_v37 = vpack.c.bf16 %v3307_v18, %v3305_v14  ;;  %v2562_v57 = vpack.c.bf16 %v3456_v1, %v3453_v41 }
  0xb6   :  { %v2530_v39 = vpack.c.bf16 %v1312_v32, %v1305_v44  ;;  %v3849_v44 = vld [vmem:[#allocation14_spill] sm:$0xff]  ;;  %v2556_v32 = vpack.c.bf16 %v3384_v51, %v3382_v16 }
  0xb7   :  { %2501 = vmatpush3.bf16.msra.mxu0 %v3515_v50 }
  0xb8   :  { %2525 = vmatpush3.bf16.msra.mxu1 %v2524_v5  ;;  %2535 = vmatprep.subr.bf16.mxu0 %v2534_v11  ;;  %v3844_v5 = vld [vmem:[#allocation12_spill] sm:$0xff]  ;;  %v3845_v11 = vand.u32 4294901760, %v3252_v0 }
  0xb9   :  { %2527 = vmatprep.subr.bf16.mxu1 %v2526_v49  ;;  %v2554_v49 = vpack.c.bf16 %v3848_v8, %v3847_v42 }
  0xba   :  { %1085 = vmatmul.mubr.f32.vlgmr.msra.gmra.mrb[6].mxu0 %v1084_v56  ;;  %v3850_v56 = vld [vmem:[#allocation15_spill] sm:$0xff] }
  0xbb   :  { %2537 = vmatpush3.bf16.msra.mxu0 %v2536_v53  ;;  %1452 = vmatprep.mubr.f32.mxu0 %v3252_v0  ;;  %v2558_v0 = vpack.c.bf16 %v3411_v62, %v3403_v6  ;;  %v3851_v53 = vld [vmem:[#allocation17_spill] sm:$0xff] }
  0xbc   :  { %2529 = vmatpush3.bf16.msra.mxu1 %v2528_v2  ;;  %2539 = vmatprep.subr.bf16.mxu0 %v2538_v47  ;;  %v2560_v2 = vpack.c.bf16 %v3447_v36, %v3418_v58  ;;  %v3852_v47 = vld [vmem:[#allocation18_spill] sm:$0xff] }
  0xbd   :  { %2531 = vmatprep.subr.bf16.mxu1 %v2530_v39  ;;  %v2550_v39 = vpack.c.bf16 %v3333_v17, %v3315_v35 }
  0xbf   :  { %2541 = vmatpush3.bf16.msra.mxu0 %v2540_v31  ;;  %v3853_v31 = vld [vmem:[#allocation19_spill] sm:$0xff] }
  0xc0   :  { %2533 = vmatpush3.bf16.msra.mxu1 %v2532_v45  ;;  %2543 = vmatprep.subr.bf16.mxu0 %v2542_v34  ;;  %v2564_v45 = vpack.c.bf16 %v3476_v54, %v3473_v48  ;;  %v3854_v34 = vand.u32 4294901760, %v3159_v43  ;;  %v3861_v43 = vand.u32 4294901760, %v3228_v40  ;;  %v3867_v40 = vand.u32 4294901760, %v3262_v10 }
  0xc1   :  { %2567 = vmatprep.subr.bf16.mxu1 %v3207_v19  ;;  %v3872_v10 = vand.u32 4294901760, %v3315_v35  ;;  %v3877_v35 = vand.u32 4294901760, %v3848_v8  ;;  %v3883_v8 = vand.u32 4294901760, %v3447_v36 }
  0xc3   :  { %1317 = vmatmul.mubr.f32.vlgmr.msra.gmra.mrb[6].mxu1 %v3433_v27  ;;  %2545 = vmatpush3.bf16.msra.mxu0 %v2544_v15  ;;  %v3855_v15 = vand.u32 4294901760, %v3161_v12  ;;  %v3862_v12 = vand.u32 4294901760, %v3233_v38  ;;  %v3868_v38 = vand.u32 4294901760, %v3278_v26  ;;  %v3873_v26 = vand.u32 4294901760, %v3333_v17 }
  0xc4   :  { %2569 = vmatpush3.bf16.msra.mxu1 %v3843_v29  ;;  %2547 = vmatprep.subr.bf16.mxu0 %v2546_v23  ;;  %v3878_v17 = vand.u32 4294901760, %v3382_v16  ;;  %v3884_v16 = vand.u32 4294901760, %v3456_v1 }
  0xc5   :  { %2571 = vmatprep.subr.bf16.mxu1 %v3844_v5  ;;  %1559 = vmatprep.mubr.f32.mxu1 %v3845_v11  ;;  %v2598_v23 = vpack.c.bf16 %v3855_v15, %v3854_v34  ;;  %v3858_v11 = vand.u32 4294901760, %v3165_v33  ;;  %v3863_v33 = vld [vmem:[#allocation13_spill] sm:$0xff]  ;;  %v3869_v34 = vand.u32 4294901760, %v3280_v9  ;;  %v2614_v9 = vpack.c.bf16 %v3873_v26, %v3872_v10 }
  0xc7   :  { %2549 = vmatpush3.bf16.msra.mxu0 %v2548_v37  ;;  %v3856_v37 = vld [vmem:[#allocation20_spill] sm:$0xff]  ;;  %v2610_v15 = vpack.c.bf16 %v3869_v34, %v3868_v38 }
  0xc8   :  { %2573 = vmatpush3.bf16.msra.mxu1 %v3846_v24  ;;  %2551 = vmatprep.subr.bf16.mxu0 %v2550_v39  ;;  %v3857_v39 = vand.u32 4294901760, %v3163_v7  ;;  %v2604_v7 = vpack.c.bf16 %v3862_v12, %v3861_v43 }
  0xc9   :  { %2575 = vmatprep.subr.bf16.mxu1 %v3849_v44 }
  0xcb   :  { %2553 = vmatpush3.bf16.msra.mxu0 %v2552_v28  ;;  %v2600_v28 = vpack.c.bf16 %v3858_v11, %v3857_v39 }
  0xcc   :  { %2577 = vmatpush3.bf16.msra.mxu1 %v3850_v56  ;;  %2555 = vmatprep.subr.bf16.mxu0 %v2554_v49  ;;  %v3859_v49 = vand.u32 4294901760, %v3219_v21  ;;  %v3864_v21 = vand.u32 4294901760, %v3247_v3  ;;  %v3870_v3 = vand.u32 4294901760, %v3305_v14  ;;  %v3875_v14 = vand.u32 4294901760, %v3356_v52 }
  0xcd   :  { %2579 = vmatprep.subr.bf16.mxu1 %v3851_v53  ;;  %v3881_v52 = vand.u32 4294901760, %v3411_v62  ;;  %v3885_v62 = vand.u32 4294901760, %v3473_v48 }
  0xcf   :  { %2557 = vmatpush3.bf16.msra.mxu0 %v2556_v32  ;;  %v3860_v32 = vand.u32 4294901760, %v3221_v25  ;;  %v3865_v25 = vand.u32 4294901760, %v3249_v63  ;;  %v3871_v63 = vand.u32 4294901760, %v3307_v18  ;;  %v3876_v18 = vand.u32 4294901760, %v3847_v42 }
  0xd0   :  { %2581 = vmatpush3.bf16.msra.mxu1 %v3852_v47  ;;  %2559 = vmatprep.subr.bf16.mxu0 %v2558_v0  ;;  %v3882_v42 = vand.u32 4294901760, %v3418_v58  ;;  %v1857_v58 = vld [vmem:[%s3681_s2] ss:$0 sm:$0xff]  ;;  %s2743_s2 = smov [#allocation7]  }
  0xd1   :  { %2583 = vmatprep.subr.bf16.mxu1 %v3853_v31  ;;  %v2602_v0 = vpack.c.bf16 %v3860_v32, %v3859_v49  ;;  %s1847_s11 = sshll.u32 %s2743_s2, 4  ;;  %s1848_s11 = int_to_ptr.vmem [resolvable:$true] %s1847_s11 }
  0xd2   :  { %s2711_s12 = scalar_lea.vmem %s1848_s11, 128  ;;  %p2716_p3 = scmp.lt.s32.totalorder %s1848_s11, %s1848_s11 }
  0xd3   :  { %2561 = vmatpush3.bf16.msra.mxu0 %v2560_v2  ;;  %v2606_v2 = vpack.c.bf16 %v3865_v25, %v3864_v21  ;;  %p2712_p2 = scmp.ne.s32.totalorder %s1848_s11, %s2711_s12  ;;  %p2717_p4 = scmp.lt.s32.totalorder %s2711_s12, %s2711_s12 }
  0xd4   :  { %2585 = vmatpush3.bf16.msra.mxu1 %v3354_v61  ;;  %2563 = vmatprep.subr.bf16.mxu0 %v2562_v57  ;;  %v3866_v57 = vand.u32 4294901760, %v3260_v60  ;;  %v2612_v60 = vpack.c.bf16 %v3871_v63, %v3870_v3 }
  0xd5   :  { %2587 = vmatprep.subr.bf16.mxu1 %v3856_v37  ;;  %p2718_p5 = por %p2717_p4, %p2716_p3 }
  0xd7   :  { %2565 = vmatpush3.bf16.msra.mxu0 %v2564_v45  ;;  %v2608_v45 = vpack.c.bf16 %v3867_v40, %v3866_v57  ;;  %p2719_p6 = pnand %p2718_p5, %p2712_p2 }
  0xd8   :  { %2589 = vmatpush3.bf16.msra.mxu1 %v3376_v20  ;;  %2599 = vmatprep.subr.bf16.mxu0 %v2598_v23 }
  0xd9   :  { %2591 = vmatprep.subr.bf16.mxu1 %v3409_v55 }
  0xda   :  { %1455 = vmatmul.mubr.f32.vlgmr.msra.gmra.mrb[8].mxu0 %v3461_v46 }
  0xdb   :  { %2601 = vmatpush3.bf16.msra.mxu0 %v2600_v28  ;;  %1729 = vmatprep.mubr.f32.mxu0 %v3863_v33 }
  0xdc   :  { %2593 = vmatpush3.bf16.msra.mxu1 %v3490_v13  ;;  %2603 = vmatprep.subr.bf16.mxu0 %v2602_v0 }
  0xdd   :  { %2595 = vmatprep.subr.bf16.mxu1 %v3492_v22 }
  0xdf   :  { %2605 = vmatpush3.bf16.msra.mxu0 %v2604_v7 }
  0xe0   :  { %2597 = vmatpush3.bf16.msra.mxu1 %v3515_v50  ;;  %2607 = vmatprep.subr.bf16.mxu0 %v2606_v2 }
  0xe1   :  { %2631 = vmatprep.subr.bf16.mxu1 %v3207_v19  ;;  %v3874_v19 = vand.u32 4294901760, %v3345_v30  ;;  %v3880_v30 = vand.u32 4294901760, %v3403_v6  ;;  %v3886_v6 = vand.u32 4294901760, %v3476_v54 }
  0xe3   :  { %1563 = vmatmul.mubr.f32.vlgmr.msra.gmra.mrb[8].mxu1 %v1082_v4  ;;  %2609 = vmatpush3.bf16.msra.mxu0 %v2608_v45  ;;  %v2616_v46 = vpack.c.bf16 %v3875_v14, %v3874_v19  ;;  %v2618_v4 = vpack.c.bf16 %v3877_v35, %v3876_v18 }
  0xe4   :  { %2633 = vmatpush3.bf16.msra.mxu1 %v3843_v29  ;;  %2611 = vmatprep.subr.bf16.mxu0 %v2610_v15  ;;  %v3879_v29 = vand.u32 4294901760, %v3384_v51  ;;  %v2626_v51 = vpack.c.bf16 %v3884_v16, %v1303_v59 }
  0xe5   :  { %2635 = vmatprep.subr.bf16.mxu1 %v3844_v5  ;;  %1833 = vmatprep.mubr.f32.mxu1 %v3863_v33 }
  0xe6   :  { %v2620_v5 = vpack.c.bf16 %v3879_v29, %v3878_v17 }
  0xe7   :  { %2613 = vmatpush3.bf16.msra.mxu0 %v2612_v60 }
  0xe8   :  { %2637 = vmatpush3.bf16.msra.mxu1 %v3846_v24  ;;  %2615 = vmatprep.subr.bf16.mxu0 %v2614_v9  ;;  %v2622_v24 = vpack.c.bf16 %v3881_v52, %v3880_v30 }
  0xe9   :  { %2639 = vmatprep.subr.bf16.mxu1 %v3849_v44  ;;  %v2624_v44 = vpack.c.bf16 %v3883_v8, %v3882_v42 }
  0xeb   :  { %2617 = vmatpush3.bf16.msra.mxu0 %v2616_v46 }
  0xec   :  { %2641 = vmatpush3.bf16.msra.mxu1 %v3850_v56  ;;  %2619 = vmatprep.subr.bf16.mxu0 %v2618_v4  ;;  %v2628_v56 = vpack.c.bf16 %v3886_v6, %v3885_v62 }
  0xed   :  { %2643 = vmatprep.subr.bf16.mxu1 %v3851_v53 }
  0xef   :  { %2621 = vmatpush3.bf16.msra.mxu0 %v2620_v5 }
  0xf0   :  { %2645 = vmatpush3.bf16.msra.mxu1 %v3852_v47  ;;  %2623 = vmatprep.subr.bf16.mxu0 %v2622_v24 }
  0xf1   :  { %2647 = vmatprep.subr.bf16.mxu1 %v3853_v31 }
  0xf3   :  { %2625 = vmatpush3.bf16.msra.mxu0 %v2624_v44 }
  0xf4   :  { %2649 = vmatpush3.bf16.msra.mxu1 %v3354_v61  ;;  %2627 = vmatprep.subr.bf16.mxu0 %v2626_v51 }
  0xf5   :  { %2651 = vmatprep.subr.bf16.mxu1 %v3856_v37 }
  0xf7   :  { %2629 = vmatpush3.bf16.msra.mxu0 %v2628_v56 }
  0xf8   :  { %2653 = vmatpush3.bf16.msra.mxu1 %v3376_v20 }
  0xf9   :  { %2655 = vmatprep.subr.bf16.mxu1 %v3409_v55 }
  0xfa   :  { %1731 = vmatmul.mubr.f32.vlgmr.msra.gmra.mrb[10].mxu0 %v3433_v27 }
  0xfc   :  { %2657 = vmatpush3.bf16.msra.mxu1 %v3490_v13 }
  0xfd   :  { %2659 = vmatprep.subr.bf16.mxu1 %v3492_v22 }
 0x100   :  { %2661 = vmatpush3.bf16.msra.mxu1 %v3515_v50 }
 0x103   :  { %1835 = vmatmul.mubr.f32.vlgmr.msra.gmra.mrb[10].mxu1 %v3433_v27 }
 0x12d   :  { %v1890_v36 = vpop.f32.mrb[0].mxu0 }
 0x12e   :  { %v1891_v1 = vpop.f32.mrb[1].mxu0 }
 0x12f   :  { %v1892_v61 = vadd.f32 %v1891_v1, %v1890_v36 }
 0x131   :  { %v225_v20 = vadd.f32 %v1892_v61, %v1857_v58 }
 0x136   :  { %v1925_v41 = vpop.f32.mrb[0].mxu1 }
 0x137   :  { %v1926_v55 = vpop.f32.mrb[1].mxu1 }
 0x138   :  { %v1927_v48 = vadd.f32 %v1926_v55, %v1925_v41 }
 0x13a   :  { %v457_v54 = vadd.f32 %v1927_v48, %v225_v20 }
 0x14d   :  { %v1960_v59 = vpop.f32.mrb[2].mxu0 }
 0x14e   :  { %v1961_v13 = vpop.f32.mrb[3].mxu0 }
 0x14f   :  { %v1962_v53 = vadd.f32 %v1961_v13, %v1960_v59 }
 0x151   :  { %v595_v22 = vadd.f32 %v1962_v53, %v457_v54 }
 0x156   :  { %v1995_v47 = vpop.f32.mrb[2].mxu1 }
 0x157   :  { %v1996_v50 = vpop.f32.mrb[3].mxu1 }
 0x158   :  { %v1997_v31 = vadd.f32 %v1996_v50, %v1995_v47 }
 0x15a   :  { %v703_v27 = vadd.f32 %v1997_v31, %v595_v22 }
 0x16d   :  { %v2030_v23 = vpop.f32.mrb[4].mxu0 }
 0x16e   :  { %v2031_v37 = vpop.f32.mrb[5].mxu0 }
 0x16f   :  { %v2032_v39 = vadd.f32 %v2031_v37, %v2030_v23 }
 0x171   :  { %v871_v11 = vadd.f32 %v2032_v39, %v703_v27 }
 0x176   :  { %v2065_v28 = vpop.f32.mrb[4].mxu1 }
 0x177   :  { %v2066_v49 = vpop.f32.mrb[5].mxu1 }
 0x178   :  { %v2067_v32 = vadd.f32 %v2066_v49, %v2065_v28 }
 0x17a   :  { %v975_v0 = vadd.f32 %v2067_v32, %v871_v11 }
 0x18d   :  { %v2100_v43 = vpop.f32.mrb[6].mxu0 }
 0x18e   :  { %v2101_v12 = vpop.f32.mrb[7].mxu0 }
 0x18f   :  { %v2102_v7 = vadd.f32 %v2101_v12, %v2100_v43 }
 0x191   :  { %v1087_v33 = vadd.f32 %v2102_v7, %v975_v0 }
 0x196   :  { %v2135_v21 = vpop.f32.mrb[6].mxu1 }
 0x197   :  { %v2136_v25 = vpop.f32.mrb[7].mxu1 }
 0x198   :  { %v2137_v2 = vadd.f32 %v2136_v25, %v2135_v21 }
 0x19a   :  { %v1319_v57 = vadd.f32 %v2137_v2, %v1087_v33 }
 0x1ad   :  { %v2170_v40 = vpop.f32.mrb[8].mxu0 }
 0x1ae   :  { %v2171_v45 = vpop.f32.mrb[9].mxu0 }
 0x1af   :  { %v2172_v38 = vadd.f32 %v2171_v45, %v2170_v40 }
 0x1b1   :  { %v1457_v34 = vadd.f32 %v2172_v38, %v1319_v57 }
 0x1b6   :  { %v2205_v15 = vpop.f32.mrb[8].mxu1 }
 0x1b7   :  { %v2206_v3 = vpop.f32.mrb[9].mxu1 }
 0x1b8   :  { %v2207_v63 = vadd.f32 %v2206_v3, %v2205_v15 }
 0x1ba   :  { %v1565_v60 = vadd.f32 %v2207_v63, %v1457_v34 }
 0x1cd   :  { %v2240_v10 = vpop.f32.mrb[10].mxu0 }
 0x1ce   :  { %v2241_v26 = vpop.f32.mrb[11].mxu0 }
 0x1cf   :  { %v2242_v9 = vadd.f32 %v2241_v26, %v2240_v10 }
 0x1d1   :  { %v1733_v19 = vadd.f32 %v2242_v9, %v1565_v60 }
 0x1d6   :  { %v2275_v14 = vpop.f32.mrb[10].mxu1 }
 0x1d7   :  { %v2276_v46 = vpop.f32.mrb[11].mxu1 }
 0x1d8   :  { %v2277_v18 = vadd.f32 %v2276_v46, %v2275_v14 }
 0x1da   :  { %v1837_v35 = vadd.f32 %v2277_v18, %v1733_v19 }
 0x1dc   :  { %1840 = vst [vmem:[#allocation7] sm:$0xff] %v1837_v35 }
 0x1dd   :  { %2722 = shalt.err (!%p2719_p6)
}
 0x1de   :  { %s2723_s15 = scalar_lea.hbm %s3682_s3, 128 }
 0x1df   :  { %p2724_p7 = scmp.ne.s32.totalorder %s3682_s3, %s2723_s15  ;;  %p2727_p8 = scmp.lt.u32.totalorder %s2723_s15, %s3682_s3 }
 0x1e1   :  { %p2729_p9 = pnand %p2727_p8, %p2724_p7 }
 0x1e3   :  { %2732 = shalt.err (!%p2729_p9)
}
 0x1e4   :  { %1850 = dma.vmem_to_hbm [thread:$0]  %s1848_s11, 128, %s3682_s3, [#allocation4]  }
 0x1e5   :  { %2737 = dma.done.wait [#allocation4], 128  }
 0x1e6   :  { %2738 = vsyncadd [#allocation4], 4294967168 }
 0x1e7   :  { %1854 = vsyncpa [#allocation3], 1 }
 0x1e8   :  { %1855 = vsyncpa [#allocation6], 1 }
 0x1e9   :  { %1856 = vsyncpa [#allocation4], 1 }

</bundles_post_ra>
